<compile_context>
chip_gen: v6e
topology: v6e:2x2x1
jax: 0.10.0
libtpu: 0.0.40
codegen_flags: <defaults>
</compile_context>

<pallas_src>
import numpy as np
import jax
import jax.numpy as jnp
from jax.experimental import pallas as pl
from jax.experimental.pallas import tpu as pltpu

STATE_DIM = 235          # forward() only reads inputs[:, 0:235]
ACTION_DIM = 6
L1_SHAPE_1 = 8
L1_SHAPE_2 = 16
CONV_FLAT = 2 * 8 * L1_SHAPE_1 + 2 * 8 * L1_SHAPE_2   # 384
NUM_FC_INPUT = CONV_FLAT + 15                          # 399
L2_SHAPE = 128

PAD_IN = 256             # lane-aligned feature dim (235 -> 256)
FUSED_N = CONV_FLAT + L2_SHAPE    # 512 = conv features | fc1-x-part
PAD_OUT = 128            # lane-dense padded output (6 -> 128)
MAX_TILE_B = 512         # sized for v7x 64 MiB VMEM; amortizes grid-step overhead


def _round_up(x, m):
    return (x + m - 1) // m * m


# ----------------------------------------------------------------------------
# Parameter init (deterministic, PyTorch-style uniform(-1/sqrt(fan_in), ...))
# ----------------------------------------------------------------------------
def _uniform(key, shape, fan_in):
    bound = 1.0 / np.sqrt(fan_in)
    return jax.random.uniform(key, shape, jnp.float32, -bound, bound)


def init_params(key):
    ks = jax.random.split(key, 12)
    p = {}
    p["tW"] = _uniform(ks[0], (L1_SHAPE_1, 1, 3), 1 * 3)
    p["tB"] = _uniform(ks[1], (L1_SHAPE_1,), 1 * 3)
    p["pW"] = _uniform(ks[2], (L1_SHAPE_1, 1, 3), 1 * 3)
    p["pB"] = _uniform(ks[3], (L1_SHAPE_1,), 1 * 3)
    p["vW"] = _uniform(ks[4], (L1_SHAPE_2, 5, 3), 5 * 3)
    p["vB"] = _uniform(ks[5], (L1_SHAPE_2,), 5 * 3)
    p["rW"] = _uniform(ks[6], (L1_SHAPE_2, 5, 3), 5 * 3)
    p["rB"] = _uniform(ks[7], (L1_SHAPE_2,), 5 * 3)
    p["fc1W"] = _uniform(ks[8], (L2_SHAPE, NUM_FC_INPUT), NUM_FC_INPUT)
    p["fc1B"] = _uniform(ks[9], (L2_SHAPE,), NUM_FC_INPUT)
    p["outW"] = _uniform(ks[10], (ACTION_DIM, L2_SHAPE), L2_SHAPE)
    p["outB"] = _uniform(ks[11], (ACTION_DIM,), L2_SHAPE)
    return p


# ----------------------------------------------------------------------------
# One-time host-side folding of convs / slicing / divides / padding.
# Call once at parameter-setup time; reuse the returned device arrays.
# ----------------------------------------------------------------------------
def prepare_weights(p):
    tW, tB = np.array(p["tW"]), np.array(p["tB"])
    pW, pB = np.array(p["pW"]), np.array(p["pB"])
    vW, vB = np.array(p["vW"]), np.array(p["vB"])
    rW, rB = np.array(p["rW"]), np.array(p["rB"])
    fc1W, fc1B = np.array(p["fc1W"]), np.array(p["fc1B"])
    outW, outB = np.array(p["outW"]), np.array(p["outB"])

    A = np.zeros((PAD_IN, FUSED_N), np.float32)
    bA = np.zeros((1, FUSED_N), np.float32)

    # throughput conv: x[:, 0:10] -> (8 ch, 8 pos) -> cols 0..63 (channel-major)
    for c in range(L1_SHAPE_1):
        for pos in range(8):
            col = c * 8 + pos
            bA[0, col] = tB[c]
            for k in range(3):
                A[0 + pos + k, col] += tW[c, 0, k]
    # playtime conv: x[:, 10:20] -> cols 64..127
    for c in range(L1_SHAPE_1):
        for pos in range(8):
            col = 64 + c * 8 + pos
            bA[0, col] = pB[c]
            for k in range(3):
                A[10 + pos + k, col] += pW[c, 0, k]
    # video_size conv: rows [0,3,6,9,12] of reshape(x[:,20:170],(15,10)) -> cols 128..255
    for c in range(L1_SHAPE_2):
        for pos in range(8):
            col = 128 + c * 8 + pos
            bA[0, col] = vB[c]
            for j in range(5):
                src_row = 3 * j
                for k in range(3):
                    A[20 + src_row * 10 + pos + k, col] += vW[c, j, k]
    # ret_rate conv: reshape(x[:,170:220],(5,10)) -> cols 256..383
    for c in range(L1_SHAPE_2):
        for pos in range(8):
            col = 256 + c * 8 + pos
            bA[0, col] = rB[c]
            for j in range(5):
                for k in range(3):
                    A[170 + j * 10 + pos + k, col] += rW[c, j, k]

    # fc1 part acting on raw features, with /1000 and /10 folded into the weights
    A[220:225, CONV_FLAT:] = fc1W[:, 384:389].T / 1000.0   # buffer / 1000
    A[225:230, CONV_FLAT:] = fc1W[:, 389:394].T / 10.0     # remain_chunks / 10
    A[230:235, CONV_FLAT:] = fc1W[:, 394:399].T            # last_level

    w1c = fc1W[:, :CONV_FLAT].T            # (384, 128), acts on conv features
    b1 = fc1B[None, :]                     # (1, 128)

    w2 = np.zeros((L2_SHAPE, PAD_OUT), np.float32)   # pad N: 6 -> 128 lanes
    w2[:, :ACTION_DIM] = outW.T
    b2 = np.zeros((1, PAD_OUT), np.float32)
    b2[0, :ACTION_DIM] = outB

    return {
        "A": jnp.asarray(A, jnp.bfloat16),
        "bA": jnp.asarray(bA, jnp.float32),
        "w1c": jnp.asarray(w1c, jnp.bfloat16),
        "b1": jnp.asarray(b1, jnp.float32),
        "w2": jnp.asarray(w2, jnp.bfloat16),
        "b2": jnp.asarray(b2, jnp.float32),
    }


# ----------------------------------------------------------------------------
# Pallas kernel: one batch tile of the whole forward pass, all in VMEM.
# ----------------------------------------------------------------------------
def cnn_kernel(x_ref, a_ref, ba_ref, w1c_ref, b1_ref, w2_ref, b2_ref, out_ref):
    x = x_ref[...]                                                     # (tb, 256) bf16
    # fused: all four Conv1d + flatten/concat AND the div-scaled fc1 x-part
    s1 = jnp.dot(x, a_ref[...], preferred_element_type=jnp.float32) + ba_ref[...]
    conv = jnp.maximum(s1[:, :CONV_FLAT], 0.0)                         # (tb, 384), ReLU
    lin = s1[:, CONV_FLAT:]                                            # (tb, 128), no ReLU
    # fc1 + ReLU
    h = (jnp.dot(conv.astype(jnp.bfloat16), w1c_ref[...],
                 preferred_element_type=jnp.float32)
         + lin + b1_ref[...])
    h = jnp.maximum(h, 0.0)                                            # (tb, 128)
    # p_output, lane-dense padded to 128 columns
    out_ref[...] = (jnp.dot(h.astype(jnp.bfloat16), w2_ref[...],
                            preferred_element_type=jnp.float32)
                    + b2_ref[...])


def cnn_forward(x, w):
    """x: (B, >=235) f32, w: output of prepare_weights()."""
    B = x.shape[0]
    tile_b = min(MAX_TILE_B, _round_up(B, 8))
    Bp = _round_up(B, tile_b)
    grid = (Bp // tile_b,)

    # pad batch to a multiple of tile_b and features to 256 lanes, cast to bf16
    xp = jnp.zeros((Bp, PAD_IN), jnp.bfloat16)
    xp = xp.at[:B, :STATE_DIM].set(x[:, :STATE_DIM].astype(jnp.bfloat16))

    const = lambda i: (0, 0)
    row = lambda i: (i, 0)

    weight_elems = PAD_IN * FUSED_N + CONV_FLAT * L2_SHAPE + L2_SHAPE * PAD_OUT
    flops = 2 * Bp * (PAD_IN * FUSED_N + CONV_FLAT * L2_SHAPE + L2_SHAPE * PAD_OUT)
    bytes_accessed = Bp * PAD_IN * 2 + Bp * PAD_OUT * 4 + weight_elems * 2

    out = pl.pallas_call(
        cnn_kernel,
        out_shape=jax.ShapeDtypeStruct((Bp, PAD_OUT), jnp.float32),
        grid_spec=pltpu.PrefetchScalarGridSpec(
            num_scalar_prefetch=0,
            grid=grid,
            in_specs=[
                pl.BlockSpec((tile_b, PAD_IN), row),          # x tile (pipelined)
                pl.BlockSpec((PAD_IN, FUSED_N), const),       # A'   (resident)
                pl.BlockSpec((1, FUSED_N), const),            # bA
                pl.BlockSpec((CONV_FLAT, L2_SHAPE), const),   # W1c
                pl.BlockSpec((1, L2_SHAPE), const),           # b1
                pl.BlockSpec((L2_SHAPE, PAD_OUT), const),     # W2 (padded)
                pl.BlockSpec((1, PAD_OUT), const),            # b2 (padded)
            ],
            out_specs=pl.BlockSpec((tile_b, PAD_OUT), row),
        ),
        compiler_params=pltpu.CompilerParams(
            dimension_semantics=("parallel",)),               # 2 TCs on v7x
        cost_estimate=pl.CostEstimate(flops=flops, transcendentals=0,
                                      bytes_accessed=bytes_accessed),
    )(xp, w["A"], w["bA"], w["w1c"], w["b1"], w["w2"], w["b2"])

    return out[:B, :ACTION_DIM]


# ----------------------------------------------------------------------------
# Pure-JAX reference (mirrors the PyTorch forward op-by-op) for validation
# ----------------------------------------------------------------------------
def reference_forward(x, p):
    def conv1d(inp, w, b):                      # inp (B,Cin,L), w (Cout,Cin,K)
        K = w.shape[-1]
        L = inp.shape[-1]
        outs = [jnp.einsum("bck,ock->bo", inp[:, :, s:s + K], w)
                for s in range(L - K + 1)]
        return jnp.stack(outs, axis=-1) + b[None, :, None]

    B = x.shape[0]
    thr = x[:, 0:10][:, None, :]
    ply = x[:, 10:20][:, None, :]
    vs = x[:, 20:170].reshape(B, 15, 10)[:, jnp.array([0, 3, 6, 9, 12])]
    rr = x[:, 170:220].reshape(B, 5, 10)
    tc = jax.nn.relu(conv1d(thr, p["tW"], p["tB"])).reshape(B, -1)
    pc = jax.nn.relu(conv1d(ply, p["pW"], p["pB"])).reshape(B, -1)
    vc = jax.nn.relu(conv1d(vs, p["vW"], p["vB"])).reshape(B, -1)
    rc = jax.nn.relu(conv1d(rr, p["rW"], p["rB"])).reshape(B, -1)
    buf = x[:, 220:225] / 1000.0
    rem = x[:, 225:230] / 10.0
    lvl = x[:, 230:235]
    merge = jnp.concatenate([tc, pc, vc, rc, buf, rem, lvl], axis=1)
    h = jax.nn.relu(merge @ p["fc1W"].T + p["fc1B"])
    return h @ p["outW"].T + p["outB"]


if __name__ == "__main__":
    key = jax.random.PRNGKey(0)
    pkey, xkey = jax.random.split(key)
    params = init_params(pkey)

    # one-time weight folding (host) -> resident device arrays, reused per call
    weights = prepare_weights(params)

    B = 2
    x = jax.random.normal(xkey, (B, STATE_DIM), jnp.float32)

    fwd = jax.jit(cnn_forward)
    q = jax.block_until_ready(fwd(x, weights))

    ref = reference_forward(x, params)
    assert q.shape == (B, ACTION_DIM)
    # bf16 operands with f32 accumulation: validate against the f32 reference
    np.testing.assert_allclose(np.array(q), np.array(ref), rtol=5e-2, atol=5e-2)

    print("KERNEL_OK")
</pallas_src>

<mosaic_0001>
module attributes {stable_mosaic.version = 11 : i64} {
  func.func @cnn_kernel(%arg0: i32, %arg1: memref<8x256xbf16, #tpu.memory_space<vmem>>, %arg2: memref<256x512xbf16, #tpu.memory_space<vmem>>, %arg3: memref<1x512xf32, #tpu.memory_space<vmem>>, %arg4: memref<384x128xbf16, #tpu.memory_space<vmem>>, %arg5: memref<1x128xf32, #tpu.memory_space<vmem>>, %arg6: memref<128x128xbf16, #tpu.memory_space<vmem>>, %arg7: memref<1x128xf32, #tpu.memory_space<vmem>>, %arg8: memref<8x128xf32, #tpu.memory_space<vmem>>) attributes {dimension_semantics = [#tpu.dimension_semantics<parallel>], iteration_bounds = array<i64: 1>, scalar_prefetch = 0 : i64, scratch_operands = 0 : i64, tpu.core_type = #tpu.core_type<tc>, window_params = [{transform_indices = @transform_0, window_bounds = array<i64: 8, 256>}, {pipeline_mode = #tpu.pipeline_mode<synchronous>, transform_indices = @transform_1, window_bounds = array<i64: 256, 512>}, {pipeline_mode = #tpu.pipeline_mode<synchronous>, transform_indices = @transform_2, window_bounds = array<i64: 1, 512>}, {pipeline_mode = #tpu.pipeline_mode<synchronous>, transform_indices = @transform_3, window_bounds = array<i64: 384, 128>}, {pipeline_mode = #tpu.pipeline_mode<synchronous>, transform_indices = @transform_4, window_bounds = array<i64: 1, 128>}, {pipeline_mode = #tpu.pipeline_mode<synchronous>, transform_indices = @transform_5, window_bounds = array<i64: 128, 128>}, {pipeline_mode = #tpu.pipeline_mode<synchronous>, transform_indices = @transform_6, window_bounds = array<i64: 1, 128>}, {transform_indices = @transform_7, window_bounds = array<i64: 8, 128>}]} {
    %c0 = arith.constant 0 : index
    %c0_0 = arith.constant 0 : index
    %0 = vector.load %arg1[%c0, %c0_0] : memref<8x256xbf16, #tpu.memory_space<vmem>>, vector<8x256xbf16>
    %c0_1 = arith.constant 0 : index
    %c0_2 = arith.constant 0 : index
    %1 = vector.load %arg2[%c0_1, %c0_2] : memref<256x512xbf16, #tpu.memory_space<vmem>>, vector<256x512xbf16>
    %cst = arith.constant dense<0.000000e+00> : vector<8x512xf32>
    %2 = tpu.matmul %0, %1, %cst {dimension_numbers = #tpu.dot_dimension_numbers<[1], [0], [0], [1], [0, 0, 1, 1], [], []>} : vector<8x256xbf16>, vector<256x512xbf16>, vector<8x512xf32> -> vector<8x512xf32>
    %c0_3 = arith.constant 0 : index
    %c0_4 = arith.constant 0 : index
    %3 = vector.load %arg3[%c0_3, %c0_4] : memref<1x512xf32, #tpu.memory_space<vmem>>, vector<1x512xf32>
    %4 = vector.broadcast %3 : vector<1x512xf32> to vector<8x512xf32>
    %5 = arith.addf %2, %4 : vector<8x512xf32>
    %6 = vector.extract_strided_slice %5 {offsets = [0, 0], sizes = [8, 384], strides = [1, 1]} : vector<8x512xf32> to vector<8x384xf32>
    %cst_5 = arith.constant 0.000000e+00 : f32
    %7 = vector.broadcast %cst_5 : f32 to vector<8x384xf32>
    %8 = arith.maximumf %6, %7 : vector<8x384xf32>
    %9 = vector.extract_strided_slice %5 {offsets = [0, 384], sizes = [8, 128], strides = [1, 1]} : vector<8x512xf32> to vector<8x128xf32>
    %10 = arith.truncf %8 : vector<8x384xf32> to vector<8x384xbf16>
    %c0_6 = arith.constant 0 : index
    %c0_7 = arith.constant 0 : index
    %11 = vector.load %arg4[%c0_6, %c0_7] : memref<384x128xbf16, #tpu.memory_space<vmem>>, vector<384x128xbf16>
    %cst_8 = arith.constant dense<0.000000e+00> : vector<8x128xf32>
    %12 = tpu.matmul %10, %11, %cst_8 {dimension_numbers = #tpu.dot_dimension_numbers<[1], [0], [0], [1], [0, 0, 1, 1], [], []>} : vector<8x384xbf16>, vector<384x128xbf16>, vector<8x128xf32> -> vector<8x128xf32>
    %13 = arith.addf %12, %9 : vector<8x128xf32>
    %c0_9 = arith.constant 0 : index
    %c0_10 = arith.constant 0 : index
    %14 = vector.load %arg5[%c0_9, %c0_10] : memref<1x128xf32, #tpu.memory_space<vmem>>, vector<1x128xf32>
    %15 = vector.broadcast %14 : vector<1x128xf32> to vector<8x128xf32>
    %16 = arith.addf %13, %15 : vector<8x128xf32>
    %cst_11 = arith.constant 0.000000e+00 : f32
    %17 = vector.broadcast %cst_11 : f32 to vector<8x128xf32>
    %18 = arith.maximumf %16, %17 : vector<8x128xf32>
    %19 = arith.truncf %18 : vector<8x128xf32> to vector<8x128xbf16>
    %c0_12 = arith.constant 0 : index
    %c0_13 = arith.constant 0 : index
    %20 = vector.load %arg6[%c0_12, %c0_13] : memref<128x128xbf16, #tpu.memory_space<vmem>>, vector<128x128xbf16>
    %cst_14 = arith.constant dense<0.000000e+00> : vector<8x128xf32>
    %21 = tpu.matmul %19, %20, %cst_14 {dimension_numbers = #tpu.dot_dimension_numbers<[1], [0], [0], [1], [0, 0, 1, 1], [], []>} : vector<8x128xbf16>, vector<128x128xbf16>, vector<8x128xf32> -> vector<8x128xf32>
    %c0_15 = arith.constant 0 : index
    %c0_16 = arith.constant 0 : index
    %22 = vector.load %arg7[%c0_15, %c0_16] : memref<1x128xf32, #tpu.memory_space<vmem>>, vector<1x128xf32>
    %23 = vector.broadcast %22 : vector<1x128xf32> to vector<8x128xf32>
    %24 = arith.addf %21, %23 : vector<8x128xf32>
    %c0_17 = arith.constant 0 : index
    %c0_18 = arith.constant 0 : index
    %25 = vector.load %arg8[%c0_17, %c0_18] : memref<8x128xf32, #tpu.memory_space<vmem>>, vector<8x128xf32>
    tpu.vector_store %arg8[%c0_17, %c0_18], %24 {strides = array<i32>} : memref<8x128xf32, #tpu.memory_space<vmem>>, vector<8x128xf32>,
    return
  }
  func.func @transform_0(%arg0: i32) -> (i32, i32) {
    %c0_i32 = arith.constant 0 : i32
    %c0_i32_0 = arith.constant 0 : i32
    return %arg0, %c0_i32 : i32, i32
  }
  func.func @transform_1(%arg0: i32) -> (i32, i32) {
    %c0_i32 = arith.constant 0 : i32
    %c0_i32_0 = arith.constant 0 : i32
    %c0_i32_1 = arith.constant 0 : i32
    return %c0_i32, %c0_i32_0 : i32, i32
  }
  func.func @transform_2(%arg0: i32) -> (i32, i32) {
    %c0_i32 = arith.constant 0 : i32
    %c0_i32_0 = arith.constant 0 : i32
    %c0_i32_1 = arith.constant 0 : i32
    return %c0_i32, %c0_i32_0 : i32, i32
  }
  func.func @transform_3(%arg0: i32) -> (i32, i32) {
    %c0_i32 = arith.constant 0 : i32
    %c0_i32_0 = arith.constant 0 : i32
    %c0_i32_1 = arith.constant 0 : i32
    return %c0_i32, %c0_i32_0 : i32, i32
  }
  func.func @transform_4(%arg0: i32) -> (i32, i32) {
    %c0_i32 = arith.constant 0 : i32
    %c0_i32_0 = arith.constant 0 : i32
    %c0_i32_1 = arith.constant 0 : i32
    return %c0_i32, %c0_i32_0 : i32, i32
  }
  func.func @transform_5(%arg0: i32) -> (i32, i32) {
    %c0_i32 = arith.constant 0 : i32
    %c0_i32_0 = arith.constant 0 : i32
    %c0_i32_1 = arith.constant 0 : i32
    return %c0_i32, %c0_i32_0 : i32, i32
  }
  func.func @transform_6(%arg0: i32) -> (i32, i32) {
    %c0_i32 = arith.constant 0 : i32
    %c0_i32_0 = arith.constant 0 : i32
    %c0_i32_1 = arith.constant 0 : i32
    return %c0_i32, %c0_i32_0 : i32, i32
  }
  func.func @transform_7(%arg0: i32) -> (i32, i32) {
    %c0_i32 = arith.constant 0 : i32
    %c0_i32_0 = arith.constant 0 : i32
    return %arg0, %c0_i32 : i32, i32
  }
}

</mosaic_0001>

<bundles_post_ra>
// kernel: cnn_forward.1
= control target key start
LH: loop header
LB: loop body
LE: loop exit
PB: predicated region body
PF: predicated region fallthrough
CT: control target
= control target key end

     0   :  { %12 = vsyncpa [#allocation3], 0  ;;  %s1446_s0 = inlined_call_operand.vmem [shape: bf16[8,256], index: 0, kind: input, shape index: {}]   ;;  %s1447_s1 = inlined_call_operand.hbm [shape: bf16[256,512], index: 1, kind: input, shape index: {}]   ;;  %s1448_s2 = inlined_call_operand.vmem [shape: f32[1,512], index: 2, kind: input, shape index: {}]   ;;  %s1449_s3 = inlined_call_operand.hbm [shape: bf16[384,128], index: 3, kind: input, shape index: {}]   ;;  %s1450_s4 = inlined_call_operand.vmem [shape: f32[1,128], index: 4, kind: input, shape index: {}]   ;;  %s1451_s5 = inlined_call_operand.hbm [shape: bf16[128,128], index: 5, kind: input, shape index: {}]   ;;  %s1452_s6 = inlined_call_operand.vmem [shape: f32[1,128], index: 6, kind: input, shape index: {}]   ;;  %s1453_s7 = inlined_call_operand.vmem [shape: f32[8,128], index: 7, kind: output, shape index: {}]  }
   0x1   :  { %13 = vsyncpa [#allocation5], 0  ;;  %s1353_s24 = smov [#allocation4]  }
   0x2   :  { %s35_s25 = sshll.u32 %s1353_s24, 4  ;;  %s36_s25 = int_to_ptr.vmem [resolvable:$true] %s35_s25 }
   0x3   :  { %s1297_s26 = scalar_lea.vmem %s36_s25, 3072  ;;  %p1302_p1 = scmp.lt.s32.totalorder %s36_s25, %s36_s25 }
   0x4   :  { %p1298_p0 = scmp.ne.s32.totalorder %s36_s25, %s1297_s26  ;;  %p1303_p2 = scmp.lt.s32.totalorder %s1297_s26, %s1297_s26 }
   0x6   :  { %p1304_p3 = por %p1303_p2, %p1302_p1 }
   0x8   :  { %p1305_p4 = pnand %p1304_p3, %p1298_p0 }
   0xa   :  { %1308 = shalt.err (!%p1305_p4)
}
   0xb   :  { %s1354_s27 = smov 64   ;;  %s1355_s28 = smov 4  }
   0xc   :  { %41 = dma.hbm_to_vmem [thread:$0]  %s1449_s3, 3072, %s36_s25, [#allocation5], %s1354_s27, %s1354_s27, %s1355_s28  }
   0xd   :  { %s1356_s8 = smov [#allocation2]  }
   0xe   :  { %s21_s9 = sshll.u32 %s1356_s8, 4  ;;  %s22_s9 = int_to_ptr.vmem [resolvable:$true] %s21_s9 }
   0xf   :  { %s1317_s10 = scalar_lea.vmem %s22_s9, 8192  ;;  %p1322_p6 = scmp.lt.s32.totalorder %s22_s9, %s22_s9 }
  0x10   :  { %p1318_p5 = scmp.ne.s32.totalorder %s22_s9, %s1317_s10  ;;  %p1323_p7 = scmp.lt.s32.totalorder %s1317_s10, %s1317_s10 }
  0x12   :  { %p1324_p8 = por %p1323_p7, %p1322_p6 }
  0x14   :  { %p1325_p9 = pnand %p1324_p8, %p1318_p5 }
  0x16   :  { %1328 = shalt.err (!%p1325_p9)
}
  0x17   :  { %s1357_s11 = smov 256   ;;  %s1358_s12 = smov 16  }
  0x18   :  { %27 = dma.hbm_to_vmem [thread:$0]  %s1447_s1, 8192, %s22_s9, [#allocation3], %s1357_s11, %s1357_s11, %s1358_s12  }
  0x19   :  { %s1359_s15 = smov [#allocation6]  }
  0x1a   :  { %s49_s16 = sshll.u32 %s1359_s15, 4  ;;  %s50_s16 = int_to_ptr.vmem [resolvable:$true] %s49_s16 }
  0x1b   :  { %s1337_s3 = scalar_lea.vmem %s50_s16, 1024  ;;  %p1342_p11 = scmp.lt.s32.totalorder %s50_s16, %s50_s16 }
  0x1c   :  { %p1338_p10 = scmp.ne.s32.totalorder %s50_s16, %s1337_s3  ;;  %p1343_p12 = scmp.lt.s32.totalorder %s1337_s3, %s1337_s3 }
  0x1e   :  { %p1344_p13 = por %p1343_p12, %p1342_p11 }
  0x20   :  { %p1345_p0 = pnand %p1344_p13, %p1338_p10 }
  0x22   :  { %1348 = shalt.err (!%p1345_p0)
}
  0x23   :  { %55 = dma.hbm_to_vmem [thread:$0]  %s1451_s5, 1024, %s50_s16, [#allocation5], %s1354_s27, %s1354_s27, %s1355_s28  }
  0x24   :  { %1349 = dma.done.wait [#allocation3], 8192  }
  0x25   :  { %1350 = vsyncadd [#allocation3], 4294959104 }
  0x26   :  { %1351 = dma.done.wait [#allocation5], 4096  }
  0x27   :  { %1352 = vsyncadd [#allocation5], 4294963200  ;;  %v1159_v0 = vld [vmem:[#allocation2 + $0xe4] ss:$16 sps:$4 sm:$0xff]   ;;  %v1161_v1 = vld [vmem:[#allocation2 + $0xe0] ss:$16 sps:$4 sm:$0xff]  }
  0x28   :  { %482 = vmatprep.subr.bf16.mxu0 %v1159_v0  ;;  %v1162_v2 = vld [vmem:[#allocation2 + $0xec] ss:$16 sps:$4 sm:$0xff]   ;;  %v1164_v3 = vld [vmem:[#allocation2 + $0xc4] ss:$16 sps:$4 sm:$0xff]   ;;  %v1166_v4 = vld [vmem:[#allocation2 + $0xe8] ss:$16 sps:$4 sm:$0xff]  }
  0x29   :  { %483 = vmatpush1.bf16.msra.mxu0 %v1161_v1  ;;  %v1167_v5 = vld [vmem:[#allocation2 + $0xc0] ss:$16 sps:$4 sm:$0xff]   ;;  %523 = vmatprep.subr.bf16.mxu1 %v1162_v2  ;;  %v1168_v6 = vld [vmem:[#allocation2 + $0xcc] ss:$16 sps:$4 sm:$0xff]   ;;  %v1170_v7 = vld [vmem:[#allocation2 + $0xa4] ss:$16 sps:$4 sm:$0xff]  }
  0x2a   :  { %484 = vmatprep.subr.bf16.mxu0 %v1164_v3  ;;  %524 = vmatpush1.bf16.msra.mxu1 %v1166_v4  ;;  %v1172_v8 = vld [vmem:[#allocation2 + $0xc8] ss:$16 sps:$4 sm:$0xff]   ;;  %v1173_v9 = vld [vmem:[#allocation2 + $0xa0] ss:$16 sps:$4 sm:$0xff]   ;;  %v1174_v10 = vld [vmem:[#allocation2 + $0xac] ss:$16 sps:$4 sm:$0xff]  }
  0x2b   :  { %525 = vmatprep.subr.bf16.mxu1 %v1168_v6  ;;  %v1176_v11 = vld [vmem:[#allocation2 + $0x84] ss:$16 sps:$4 sm:$0xff]   ;;  %v1178_v12 = vld [vmem:[#allocation2 + $0xa8] ss:$16 sps:$4 sm:$0xff]   ;;  %v1180_v13 = vld [vmem:[#allocation2 + $0x8c] ss:$16 sps:$4 sm:$0xff]  }
  0x2c   :  { %v1179_v14 = vld [vmem:[#allocation2 + $0x80] ss:$16 sps:$4 sm:$0xff]   ;;  %v1182_v15 = vld [vmem:[#allocation2 + $0x64] ss:$16 sps:$4 sm:$0xff]   ;;  %v1184_v16 = vld [vmem:[#allocation2 + $0x88] ss:$16 sps:$4 sm:$0xff]  }
  0x2d   :  { %485 = vmatpush1.bf16.msra.mxu0 %v1167_v5  ;;  %v1186_v17 = vld [vmem:[#allocation2 + $0x6c] ss:$16 sps:$4 sm:$0xff]   ;;  %v1185_v18 = vld [vmem:[#allocation2 + $0x60] ss:$16 sps:$4 sm:$0xff]   ;;  %v1188_v19 = vld [vmem:[#allocation2 + $0x44] ss:$16 sps:$4 sm:$0xff]  }
  0x2e   :  { %486 = vmatprep.subr.bf16.mxu0 %v1170_v7  ;;  %526 = vmatpush1.bf16.msra.mxu1 %v1172_v8  ;;  %v1190_v20 = vld [vmem:[#allocation2 + $0x68] ss:$16 sps:$4 sm:$0xff]   ;;  %v1192_v21 = vld [vmem:[#allocation2 + $0x4c] ss:$16 sps:$4 sm:$0xff]   ;;  %v1191_v22 = vld [vmem:[#allocation2 + $0x40] ss:$16 sps:$4 sm:$0xff]  }
  0x2f   :  { %527 = vmatprep.subr.bf16.mxu1 %v1174_v10  ;;  %v1194_v23 = vld [vmem:[#allocation2 + $0x24] ss:$16 sps:$4 sm:$0xff]   ;;  %v1196_v24 = vld [vmem:[#allocation2 + $0x48] ss:$16 sps:$4 sm:$0xff]   ;;  %v1198_v25 = vld [vmem:[#allocation2 + $0x2c] ss:$16 sps:$4 sm:$0xff]  }
  0x30   :  { %v1197_v26 = vld [vmem:[#allocation2 + $0x20] ss:$16 sps:$4 sm:$0xff]   ;;  %v1200_v27 = vld [vmem:[#allocation2 + $0x4] ss:$16 sps:$4 sm:$0xff]   ;;  %v1202_v28 = vld [vmem:[#allocation2 + $0x28] ss:$16 sps:$4 sm:$0xff]  }
  0x31   :  { %487 = vmatpush1.bf16.msra.mxu0 %v1173_v9  ;;  %v1204_v29 = vld [vmem:[#allocation2 + $0xc] ss:$16 sps:$4 sm:$0xff]   ;;  %v1203_v30 = vld [vmem:[#allocation2] ss:$16 sps:$4 sm:$0xff]   ;;  %v1206_v31 = vld [vmem:[#allocation2 + $0x1e4] ss:$16 sps:$4 sm:$0xff]  }
  0x32   :  { %488 = vmatprep.subr.bf16.mxu0 %v1176_v11  ;;  %528 = vmatpush1.bf16.msra.mxu1 %v1178_v12  ;;  %v1208_v32 = vld [vmem:[#allocation2 + $0x8] ss:$16 sps:$4 sm:$0xff]   ;;  %v1210_v33 = vld [vmem:[#allocation2 + $0x1ec] ss:$16 sps:$4 sm:$0xff]   ;;  %v1209_v34 = vld [vmem:[#allocation2 + $0x1e0] ss:$16 sps:$4 sm:$0xff]  }
  0x33   :  { %529 = vmatprep.subr.bf16.mxu1 %v1180_v13  ;;  %v1212_v35 = vld [vmem:[#allocation2 + $0x1c4] ss:$16 sps:$4 sm:$0xff]   ;;  %v1214_v36 = vld [vmem:[#allocation2 + $0x1e8] ss:$16 sps:$4 sm:$0xff]   ;;  %v1216_v37 = vld [vmem:[#allocation2 + $0x1cc] ss:$16 sps:$4 sm:$0xff]  }
  0x34   :  { %v1215_v38 = vld [vmem:[#allocation2 + $0x1c0] ss:$16 sps:$4 sm:$0xff]   ;;  %v1218_v39 = vld [vmem:[#allocation2 + $0x1a4] ss:$16 sps:$4 sm:$0xff]   ;;  %v1220_v40 = vld [vmem:[#allocation2 + $0x1c8] ss:$16 sps:$4 sm:$0xff]  }
  0x35   :  { %489 = vmatpush1.bf16.msra.mxu0 %v1179_v14  ;;  %v1222_v41 = vld [vmem:[#allocation2 + $0x1ac] ss:$16 sps:$4 sm:$0xff]   ;;  %v1221_v42 = vld [vmem:[#allocation2 + $0x1a0] ss:$16 sps:$4 sm:$0xff]   ;;  %v1224_v43 = vld [vmem:[#allocation2 + $0x184] ss:$16 sps:$4 sm:$0xff]  }
  0x36   :  { %490 = vmatprep.subr.bf16.mxu0 %v1182_v15  ;;  %530 = vmatpush1.bf16.msra.mxu1 %v1184_v16  ;;  %v1226_v44 = vld [vmem:[#allocation2 + $0x1a8] ss:$16 sps:$4 sm:$0xff]   ;;  %v68_v45 = vld [vmem:[%s1446_s0] sm:$0xff]  ;;  %v1228_v47 = vld [vmem:[#allocation2 + $0x18c] ss:$16 sps:$4 sm:$0xff]   ;;  %v1360_v8 = vmov 0.0  }
  0x37   :  { %531 = vmatprep.subr.bf16.mxu1 %v1186_v17  ;;  %v1227_v46 = vld [vmem:[#allocation2 + $0x180] ss:$16 sps:$4 sm:$0xff]   ;;  %v971_v48 = vcombine.high %v68_v45, %v68_v45  ;;  %v1230_v49 = vld [vmem:[#allocation2 + $0x164] ss:$16 sps:$4 sm:$0xff]   ;;  %v1232_v50 = vld [vmem:[#allocation2 + $0x188] ss:$16 sps:$4 sm:$0xff]   ;;  %v970_v4 = vcombine.low %v68_v45, %v68_v45 }
  0x38   :  { %v1233_v51 = vld [vmem:[#allocation2 + $0x160] ss:$16 sps:$4 sm:$0xff]   ;;  %v1234_v52 = vld [vmem:[#allocation2 + $0x16c] ss:$16 sps:$4 sm:$0xff]   ;;  %v1236_v53 = vld [vmem:[#allocation2 + $0x144] ss:$16 sps:$4 sm:$0xff]  }
  0x39   :  { %491 = vmatpush1.bf16.msra.mxu0 %v1185_v18  ;;  %514 = vmatprep.mubr.bf16.mxu0 %v971_v48  ;;  %v1238_v54 = vld [vmem:[#allocation2 + $0x168] ss:$16 sps:$4 sm:$0xff]   ;;  %v1239_v55 = vld [vmem:[#allocation2 + $0x140] ss:$16 sps:$4 sm:$0xff]   ;;  %v1240_v56 = vld [vmem:[#allocation2 + $0x14c] ss:$16 sps:$4 sm:$0xff]  }
  0x3a   :  { %492 = vmatprep.subr.bf16.mxu0 %v1188_v19  ;;  %532 = vmatpush1.bf16.msra.mxu1 %v1190_v20  ;;  %v1242_v57 = vld [vmem:[#allocation2 + $0x124] ss:$16 sps:$4 sm:$0xff]   ;;  %v1244_v58 = vld [vmem:[#allocation2 + $0x148] ss:$16 sps:$4 sm:$0xff]   ;;  %v1245_v59 = vld [vmem:[#allocation2 + $0x120] ss:$16 sps:$4 sm:$0xff]  }
  0x3b   :  { %533 = vmatprep.subr.bf16.mxu1 %v1192_v21  ;;  %555 = vmatprep.mubr.bf16.mxu1 %v971_v48  ;;  %v1246_v60 = vld [vmem:[#allocation2 + $0x12c] ss:$16 sps:$4 sm:$0xff]   ;;  %v1248_v61 = vld [vmem:[#allocation2 + $0x104] ss:$16 sps:$4 sm:$0xff]   ;;  %v1250_v62 = vld [vmem:[#allocation2 + $0x128] ss:$16 sps:$4 sm:$0xff]  }
  0x3c   :  { %v1251_v63 = vld [vmem:[#allocation2 + $0x100] ss:$16 sps:$4 sm:$0xff]   ;;  %v1254_v0 = vld [vmem:[#allocation2 + $0x10c] ss:$16 sps:$4 sm:$0xff]   ;;  %v1256_v1 = vld [vmem:[#allocation2 + $0x108] ss:$16 sps:$4 sm:$0xff]  }
  0x3d   :  { %493 = vmatpush1.bf16.msra.mxu0 %v1191_v22  ;;  %v1257_v2 = vld [vmem:[#allocation4 + $0x78] sm:$0xff]   ;;  %v1260_v5 = vld [vmem:[#allocation4 + $0x70] sm:$0xff]   ;;  %v1263_v9 = vld [vmem:[#allocation4 + $0x68] sm:$0xff]   ;;  %vm1361_vm0 = vmmov 0  }
  0x3e   :  { %494 = vmatprep.subr.bf16.mxu0 %v1194_v23  ;;  %534 = vmatpush1.bf16.msra.mxu1 %v1196_v24  ;;  %v1258_v3 = vld [vmem:[#allocation4 + $0x38] sm:$0xff]   ;;  %v1261_v7 = vld [vmem:[#allocation4 + $0x30] sm:$0xff]   ;;  %v1264_v11 = vld [vmem:[#allocation4 + $0x28] sm:$0xff]  }
  0x3f   :  { %535 = vmatprep.subr.bf16.mxu1 %v1198_v25  ;;  %v1259_v6 = vld [vmem:[#allocation4 + $0xb8] sm:$0xff]   ;;  %v1262_v10 = vld [vmem:[#allocation4 + $0xb0] sm:$0xff]   ;;  %v1266_v12 = vld [vmem:[#allocation4 + $0x60] sm:$0xff]  }
  0x40   :  { %v1265_v13 = vld [vmem:[#allocation4 + $0xa8] sm:$0xff]   ;;  %v1267_v14 = vld [vmem:[#allocation4 + $0x20] sm:$0xff]   ;;  %v1269_v15 = vld [vmem:[#allocation4 + $0x58] sm:$0xff]  }
  0x41   :  { %495 = vmatpush1.bf16.msra.mxu0 %v1197_v26  ;;  %v1268_v16 = vld [vmem:[#allocation4 + $0xa0] sm:$0xff]   ;;  %v1270_v17 = vld [vmem:[#allocation4 + $0x18] sm:$0xff]   ;;  %v1272_v18 = vld [vmem:[#allocation4 + $0x50] sm:$0xff]  }
  0x42   :  { %496 = vmatprep.subr.bf16.mxu0 %v1200_v27  ;;  %536 = vmatpush1.bf16.msra.mxu1 %v1202_v28  ;;  %v1271_v19 = vld [vmem:[#allocation4 + $0x98] sm:$0xff]   ;;  %v1273_v20 = vld [vmem:[#allocation4 + $0x10] sm:$0xff]   ;;  %v1275_v22 = vld [vmem:[#allocation4 + $0x48] sm:$0xff]   ;;  %v135_v28 = vlaneseq }
  0x43   :  { %537 = vmatprep.subr.bf16.mxu1 %v1204_v29  ;;  %v1274_v21 = vld [vmem:[#allocation4 + $0x90] sm:$0xff]   ;;  %v1276_v23 = vld [vmem:[#allocation4 + $0x8] sm:$0xff]   ;;  %v1278_v25 = vld [vmem:[#allocation4 + $0x40] sm:$0xff]  }
  0x44   :  { %v1277_v24 = vld [vmem:[#allocation4 + $0x88] sm:$0xff]   ;;  %v1279_v26 = vld [vmem:[#allocation4] sm:$0xff]   ;;  %v136_v29 = vshrl.u32 %v135_v28, 7 }
  0x45   :  { %497 = vmatpush1.bf16.msra.mxu0 %v1203_v30  ;;  %v1280_v27 = vld [vmem:[#allocation4 + $0x80] sm:$0xff]  }
  0x46   :  { %498 = vmatprep.subr.bf16.mxu0 %v1206_v31  ;;  %538 = vmatpush1.bf16.msra.mxu1 %v1208_v32  ;;  %v137_v30 = vsub.s32 0, %v136_v29  ;;  %v133_v31 = vld [vmem:[%s1448_s2] sm:$0xf]  ;;  %v141_v32 = vsub.s32 1, %v136_v29 }
  0x47   :  { %539 = vmatprep.subr.bf16.mxu1 %v1210_v33  ;;  %v145_v33 = vsub.s32 2, %v136_v29 }
  0x49   :  { %499 = vmatpush2.bf16.msra.mxu0 %v1209_v34  ;;  %v138_v34 = vrot.slane %v133_v31, %v137_v30 }
  0x4a   :  { %500 = vmatprep.subr.bf16.mxu0 %v1212_v35  ;;  %540 = vmatpush2.bf16.msra.mxu1 %v1214_v36  ;;  %v142_v35 = vrot.slane %v133_v31, %v141_v32  ;;  %v146_v36 = vrot.slane %v133_v31, %v145_v33 }
  0x4b   :  { %541 = vmatprep.subr.bf16.mxu1 %v1216_v37 }
  0x4d   :  { %501 = vmatpush2.bf16.msra.mxu0 %v1215_v38 }
  0x4e   :  { %502 = vmatprep.subr.bf16.mxu0 %v1218_v39  ;;  %542 = vmatpush2.bf16.msra.mxu1 %v1220_v40 }
  0x4f   :  { %543 = vmatprep.subr.bf16.mxu1 %v1222_v41 }
  0x51   :  { %503 = vmatpush2.bf16.msra.mxu0 %v1221_v42 }
  0x52   :  { %504 = vmatprep.subr.bf16.mxu0 %v1224_v43  ;;  %544 = vmatpush2.bf16.msra.mxu1 %v1226_v44 }
  0x53   :  { %545 = vmatprep.subr.bf16.mxu1 %v1228_v47 }
  0x55   :  { %505 = vmatpush2.bf16.msra.mxu0 %v1227_v46 }
  0x56   :  { %506 = vmatprep.subr.bf16.mxu0 %v1230_v49  ;;  %546 = vmatpush2.bf16.msra.mxu1 %v1232_v50 }
  0x57   :  { %547 = vmatprep.subr.bf16.mxu1 %v1234_v52  ;;  %v1281_v52 = vld [vmem:[#allocation6 + $0x38] sm:$0xff]  }
  0x59   :  { %507 = vmatpush2.bf16.msra.mxu0 %v1233_v51 }
  0x5a   :  { %508 = vmatprep.subr.bf16.mxu0 %v1236_v53  ;;  %548 = vmatpush2.bf16.msra.mxu1 %v1238_v54 }
  0x5b   :  { %549 = vmatprep.subr.bf16.mxu1 %v1240_v56  ;;  %v1283_v56 = vld [vmem:[#allocation6 + $0x28] sm:$0xff]  }
  0x5d   :  { %509 = vmatpush2.bf16.msra.mxu0 %v1239_v55  ;;  %v1282_v55 = vld [vmem:[#allocation6 + $0x30] sm:$0xff]  }
  0x5e   :  { %510 = vmatprep.subr.bf16.mxu0 %v1242_v57  ;;  %550 = vmatpush2.bf16.msra.mxu1 %v1244_v58  ;;  %v1284_v57 = vld [vmem:[#allocation6 + $0x20] sm:$0xff]   ;;  %v1285_v58 = vld [vmem:[#allocation6 + $0x18] sm:$0xff]  }
  0x5f   :  { %551 = vmatprep.subr.bf16.mxu1 %v1246_v60  ;;  %v1287_v60 = vld [vmem:[#allocation6 + $0x8] sm:$0xff]  }
  0x61   :  { %511 = vmatpush2.bf16.msra.mxu0 %v1245_v59  ;;  %v1286_v59 = vld [vmem:[#allocation6 + $0x10] sm:$0xff]  }
  0x62   :  { %512 = vmatprep.subr.bf16.mxu0 %v1248_v61  ;;  %552 = vmatpush2.bf16.msra.mxu1 %v1250_v62  ;;  %v1288_v61 = vld [vmem:[#allocation6] sm:$0xff]   ;;  %v149_v62 = vsub.s32 3, %v136_v29 }
  0x63   :  { %553 = vmatprep.subr.bf16.mxu1 %v1254_v0 }
  0x65   :  { %513 = vmatpush2.bf16.msra.mxu0 %v1251_v63  ;;  %v150_v63 = vrot.slane %v133_v31, %v149_v62 }
  0x66   :  { %1070 = vmatprep.subr.bf16.mxu0 %v1257_v2  ;;  %554 = vmatpush2.bf16.msra.mxu1 %v1256_v1 }
  0x67   :  { %1110 = vmatprep.subr.bf16.mxu1 %v1360_v8 }
  0x68   :  { %515 = vmatmul.mubr.bf16.vlgmr.msra.gmra.mxu0 %v970_v4 }
  0x69   :  { %1071 = vmatpush3.bf16.msra.mxu0 %v1258_v3  ;;  %556 = vmatmul.mubr.bf16.vlgmr.msra.gmra.mxu1 %v970_v4 }
  0x6a   :  { %1072 = vmatprep.subr.bf16.mxu0 %v1260_v5  ;;  %1111 = vmatpush3.bf16.msra.mxu1 %v1259_v6 }
  0x6b   :  { %1112 = vmatprep.subr.bf16.mxu1 %v1360_v8  ;;  %1126 = vmatprep.mubr.msk.bf16.mxu1 %vm1361_vm0, %v1360_v8 }
  0x6d   :  { %1073 = vmatpush3.bf16.msra.mxu0 %v1261_v7 }
  0x6e   :  { %1074 = vmatprep.subr.bf16.mxu0 %v1263_v9  ;;  %1113 = vmatpush3.bf16.msra.mxu1 %v1262_v10 }
  0x6f   :  { %1114 = vmatprep.subr.bf16.mxu1 %v1360_v8 }
  0x71   :  { %1075 = vmatpush3.bf16.msra.mxu0 %v1264_v11  ;;  %v1060_v11 = vld [vmem:[%s1450_s4] ss:$0 sm:$0xff] }
  0x72   :  { %1076 = vmatprep.subr.bf16.mxu0 %v1266_v12  ;;  %1115 = vmatpush3.bf16.msra.mxu1 %v1265_v13 }
  0x73   :  { %1116 = vmatprep.subr.bf16.mxu1 %v1360_v8 }
  0x75   :  { %1077 = vmatpush3.bf16.msra.mxu0 %v1267_v14 }
  0x76   :  { %1078 = vmatprep.subr.bf16.mxu0 %v1269_v15  ;;  %1117 = vmatpush3.bf16.msra.mxu1 %v1268_v16  ;;  %v1061_v16 = vld [vmem:[%s1452_s6] ss:$0 sm:$0xff] }
  0x77   :  { %1118 = vmatprep.subr.bf16.mxu1 %v1360_v8 }
  0x79   :  { %1079 = vmatpush3.bf16.msra.mxu0 %v1270_v17 }
  0x7a   :  { %1080 = vmatprep.subr.bf16.mxu0 %v1272_v18  ;;  %1119 = vmatpush3.bf16.msra.mxu1 %v1271_v19 }
  0x7b   :  { %1120 = vmatprep.subr.bf16.mxu1 %v1360_v8 }
  0x7d   :  { %1081 = vmatpush3.bf16.msra.mxu0 %v1273_v20 }
  0x7e   :  { %1121 = vmatpush3.bf16.msra.mxu1 %v1274_v21  ;;  %1082 = vmatprep.subr.bf16.mxu0 %v1275_v22 }
  0x7f   :  { %1122 = vmatprep.subr.bf16.mxu1 %v1360_v8 }
  0x81   :  { %1083 = vmatpush3.bf16.msra.mxu0 %v1276_v23 }
  0x82   :  { %1123 = vmatpush3.bf16.msra.mxu1 %v1277_v24  ;;  %1084 = vmatprep.subr.bf16.mxu0 %v1278_v25 }
  0x83   :  { %1124 = vmatprep.subr.bf16.mxu1 %v1360_v8 }
  0x85   :  { %1085 = vmatpush3.bf16.msra.mxu0 %v1279_v26 }
  0x86   :  { %1125 = vmatpush3.bf16.msra.mxu1 %v1280_v27  ;;  %1130 = vmatprep.subr.bf16.mxu0 %v1360_v8 }
 0x128   :  { %v516_v37 = vpop.f32.mrf.mxu0 }
 0x129   :  { %v517_v38 = vadd.f32 %v516_v37, %v138_v34  ;;  %v557_v40 = vpop.f32.mrf.mxu1 }
 0x12a   :  { %v518_v39 = vpop.f32.mrf.mxu0  ;;  %v558_v42 = vadd.f32 %v557_v40, %v146_v36 }
 0x12b   :  { %v519_v41 = vadd.f32 %v518_v39, %v142_v35  ;;  %v564_v43 = vmax.f32 %v517_v38, 0.0  ;;  %v559_v45 = vpop.f32.mrf.mxu1 }
 0x12c   :  { %v520_v44 = vpop.f32.mrf.mxu0  ;;  %v566_v47 = vmax.f32 %v558_v42, 0.0  ;;  %v560_v4 = vadd.f32 %v559_v45, %v150_v63 }
 0x12d   :  { %v565_v46 = vmax.f32 %v519_v41, 0.0  ;;  %v561_v49 = vpop.f32.mrf.mxu1  ;;  %v567_v53 = vpack.c.bf16 %v564_v43, %v564_v43 }
 0x12e   :  { %v521_v48 = vpop.f32.mrf.mxu0  ;;  %v569_v51 = vpack.c.bf16 %v566_v47, %v566_v47 }
 0x12f   :  { %v568_v50 = vpack.c.bf16 %v565_v46, %v565_v46  ;;  %v562_v54 = vpop.f32.mrf.mxu1 }
 0x130   :  { %1127 = vmatmul.mubr.bf16.vlgmr.msra.gmra.mxu1 %v569_v51 }
 0x131   :  { %794 = vmatprep.mubr.bf16.mxu0 %v568_v50 }
 0x132   :  { %795 = vmatmul.mubr.bf16.vlgmr.msra.gmra.mxu0 %v567_v53 }
 0x133   :  { %1131 = vmatpush3.bf16.msra.mxu0 %v1281_v52  ;;  %1146 = vmatprep.mubr.msk.bf16.mxu0 %vm1361_vm0, %v1360_v8 }
 0x134   :  { %1132 = vmatprep.subr.bf16.mxu0 %v1360_v8 }
 0x137   :  { %1133 = vmatpush3.bf16.msra.mxu0 %v1282_v55 }
 0x138   :  { %1134 = vmatprep.subr.bf16.mxu0 %v1360_v8 }
 0x13b   :  { %1135 = vmatpush3.bf16.msra.mxu0 %v1283_v56 }
 0x13c   :  { %1136 = vmatprep.subr.bf16.mxu0 %v1360_v8 }
 0x13f   :  { %1137 = vmatpush3.bf16.msra.mxu0 %v1284_v57 }
 0x140   :  { %1138 = vmatprep.subr.bf16.mxu0 %v1360_v8 }
 0x143   :  { %1139 = vmatpush3.bf16.msra.mxu0 %v1285_v58 }
 0x144   :  { %1140 = vmatprep.subr.bf16.mxu0 %v1360_v8 }
 0x147   :  { %1141 = vmatpush3.bf16.msra.mxu0 %v1286_v59 }
 0x148   :  { %1142 = vmatprep.subr.bf16.mxu0 %v1360_v8 }
 0x14b   :  { %1143 = vmatpush3.bf16.msra.mxu0 %v1287_v60 }
 0x14c   :  { %1144 = vmatprep.subr.bf16.mxu0 %v1360_v8 }
 0x14f   :  { %1145 = vmatpush3.bf16.msra.mxu0 %v1288_v61 }
 0x1f0   :  { %v836_v0 = vpop.f32.mrf.mxu1 }
 0x1f2   :  { %v1086_v1 = vpop.f32.mrf.mxu0  ;;  %v1128_v2 = vpop.f32.mrf.mxu1 }
 0x1f4   :  { %v1087_v3 = vpop.f32.mrf.mxu0  ;;  %v839_v6 = vpop.f32.mrf.mxu1 }
 0x1f5   :  { %v1088_v5 = vadd.f32 %v1087_v3, %v1086_v1 }
 0x1f6   :  { %v1089_v7 = vpop.f32.mrf.mxu0  ;;  %v1129_v10 = vpop.f32.mrf.mxu1 }
 0x1f7   :  { %v797_v9 = vadd.f32 %v1088_v5, %v560_v4 }
 0x1f8   :  { %v1090_v12 = vpop.f32.mrf.mxu0 }
 0x1f9   :  { %v837_v8 = vadd.f32 %v836_v0, %v797_v9 }
 0x1fb   :  { %v849_v13 = vadd.f32 %v1060_v11, %v837_v8 }
 0x1fd   :  { %v850_v14 = vmax.f32 %v849_v13, 0.0 }
 0x1ff   :  { %v851_v15 = vpack.c.bf16 %v850_v14, %v850_v14 }
 0x201   :  { %1147 = vmatmul.mubr.bf16.vlgmr.msra.gmra.mxu0 %v851_v15 }
 0x2c1   :  { %v957_v17 = vpop.f32.mrf.mxu0 }
 0x2c2   :  { %v958_v18 = vadd.f32 %v1061_v16, %v957_v17 }
 0x2c3   :  { %v1148_v19 = vpop.f32.mrf.mxu0 }
 0x2c4   :  { %963 = vst [vmem:[%s1453_s7] sm:$0xff] %v958_v18 }
 0x2c5   :  { %v960_v20 = vpop.f32.mrf.mxu0 }
 0x2c7   :  { %v1149_v21 = vpop.f32.mrf.mxu0 }
 0x2c8   :  { %968 = vsyncpa [#allocation3], 1 }
 0x2c9   :  { %969 = vsyncpa [#allocation5], 1 }

</bundles_post_ra>
